<compile_context>
chip_gen: v7x
topology: tpu7x:2x2x1
jax: 0.10.0
libtpu: 0.0.40
codegen_flags: <defaults>
</compile_context>

<pallas_src>
import jax
import jax.numpy as jnp
from jax.experimental import pallas as pl
from jax.experimental.pallas import tpu as pltpu


def diff_predictor_kernel(x1_ref, x2_ref, w3_ref, b3_ref,
                          w4a_ref, w4b_ref, b4_ref, o_ref, xcat_ref):
    tb = x1_ref.shape[0]

    # Stack both inputs into one tile -> single fc3 MXU pass (shared weights).
    xcat_ref[0:tb, :] = x1_ref[...]
    xcat_ref[tb:2 * tb, :] = x2_ref[...]

    # fc3 + tanh on the stacked [2*TB, fd1] tile; accumulate/bias/tanh in f32.
    v = jnp.tanh(
        jnp.dot(xcat_ref[...], w3_ref[...], preferred_element_type=jnp.float32)
        + b3_ref[...]
    )
    v1 = v[0:tb, :]
    v2 = v[tb:2 * tb, :]

    # fc4 on concat([v1, v2], axis=1)  ==  v1 @ W4a + v2 @ W4b + b4.
    # Done as VPU multiply + cross-lane sum (no MXU round trip for N=1).
    r = v1 * w4a_ref[...] + v2 * w4b_ref[...]
    out = jnp.sum(r, axis=-1, keepdims=True) + b4_ref[...]
    o_ref[...] = out.astype(o_ref.dtype)


def _round_up(x, m):
    return ((x + m - 1) // m) * m


def diff_predictor(img_fea1, img_fea2, params, *,
                   block_b=1024, use_bf16_matmul=False):
    """img_fea1, img_fea2: [B, fea_dim1] float32. Returns [B, 1] float32."""
    B, fd1 = img_fea1.shape

    # Weight prep (PyTorch Linear stores (out, in); pre-transpose to (in, out)).
    w3_t = jnp.asarray(params["w3"]).T                    # (fd1, fd2)
    fd2 = w3_t.shape[1]
    b3 = jnp.asarray(params["b3"]).reshape(1, fd2).astype(jnp.float32)
    w4_row = jnp.asarray(params["w4"]).reshape(2 * fd2).astype(jnp.float32)
    w4a = w4_row[:fd2].reshape(1, fd2)                    # multiplies val1
    w4b = w4_row[fd2:].reshape(1, fd2)                    # multiplies val2
    b4 = jnp.asarray(params["b4"]).reshape(1, 1).astype(jnp.float32)

    # Optional bf16 feed for the MXU operands only (f32 accumulate in-kernel).
    in_dtype = jnp.bfloat16 if use_bf16_matmul else jnp.float32
    w3_t = w3_t.astype(in_dtype)
    x1 = img_fea1.astype(in_dtype)
    x2 = img_fea2.astype(in_dtype)

    # Batch tiling: sublane-aligned tile, batch padded to a multiple of it.
    tb = min(_round_up(block_b, 8), _round_up(B, 8))
    bp = _round_up(B, tb)
    if bp != B:
        pad = ((0, bp - B), (0, 0))
        x1 = jnp.pad(x1, pad)
        x2 = jnp.pad(x2, pad)
    nt = bp // tb

    batch_spec = pl.BlockSpec((tb, fd1), lambda i: (i, 0))
    resident = lambda shape: pl.BlockSpec(shape, lambda i: (0, 0))

    out_p = pl.pallas_call(
        diff_predictor_kernel,
        out_shape=jax.ShapeDtypeStruct((bp, 1), jnp.float32),
        grid=(nt,),
        in_specs=[
            batch_spec,                 # x1
            batch_spec,                 # x2
            resident((fd1, fd2)),       # w3^T   (VMEM-resident across grid)
            resident((1, fd2)),         # b3
            resident((1, fd2)),         # w4a row
            resident((1, fd2)),         # w4b row
            resident((1, 1)),           # b4
        ],
        out_specs=pl.BlockSpec((tb, 1), lambda i: (i, 0)),
        scratch_shapes=[pltpu.VMEM((2 * tb, fd1), in_dtype)],
        compiler_params=pltpu.CompilerParams(
            dimension_semantics=("parallel",)),
    )(x1, x2, w3_t, b3, w4a, w4b, b4)

    return out_p[:B]


def init_params(key, fea_dim1=96, fea_dim2=8):
    """Deterministic synthetic init mimicking nn.Linear shapes."""
    k1, k2, k3, k4 = jax.random.split(key, 4)
    bound3 = 1.0 / jnp.sqrt(fea_dim1)
    bound4 = 1.0 / jnp.sqrt(2 * fea_dim2)
    return {
        "w3": jax.random.uniform(k1, (fea_dim2, fea_dim1), jnp.float32,
                                 -bound3, bound3),
        "b3": jax.random.uniform(k2, (fea_dim2,), jnp.float32,
                                 -bound3, bound3),
        "w4": jax.random.uniform(k3, (1, 2 * fea_dim2), jnp.float32,
                                 -bound4, bound4),
        "b4": jax.random.uniform(k4, (1,), jnp.float32, -bound4, bound4),
    }


def reference(img_fea1, img_fea2, params):
    v1 = jnp.tanh(img_fea1 @ params["w3"].T + params["b3"])
    v2 = jnp.tanh(img_fea2 @ params["w3"].T + params["b3"])
    val = jnp.concatenate([v1, v2], axis=1)
    return val @ params["w4"].T + params["b4"]


if __name__ == "__main__":
    key = jax.random.PRNGKey(0)
    kp, kx1, kx2, kx3, kx4 = jax.random.split(key, 5)

    fea_dim1, fea_dim2 = 96, 8
    params = init_params(kp, fea_dim1, fea_dim2)

    # --- Case 1: module-sized input (B=2), f32, single tile -----------------
    B = 2
    x1 = jax.random.normal(kx1, (B, fea_dim1), jnp.float32)
    x2 = jax.random.normal(kx2, (B, fea_dim1), jnp.float32)
    out = jax.block_until_ready(diff_predictor(x1, x2, params))
    ref = reference(x1, x2, params)
    assert out.shape == (B, 1)
    assert jnp.allclose(out, ref, atol=1e-5, rtol=1e-5), (out, ref)

    # --- Case 2: larger batch exercising the batch grid + padding -----------
    B2 = 300
    y1 = jax.random.normal(kx3, (B2, fea_dim1), jnp.float32)
    y2 = jax.random.normal(kx4, (B2, fea_dim1), jnp.float32)
    out2 = jax.block_until_ready(diff_predictor(y1, y2, params, block_b=128))
    ref2 = reference(y1, y2, params)
    assert out2.shape == (B2, 1)
    assert jnp.allclose(out2, ref2, atol=1e-5, rtol=1e-5), (out2, ref2)

    # --- Case 3: bf16 MXU feed (f32 accumulate / epilogue), loose tolerance -
    out3 = jax.block_until_ready(
        diff_predictor(y1, y2, params, block_b=128, use_bf16_matmul=True))
    assert out3.shape == (B2, 1)
    assert jnp.max(jnp.abs(out3 - ref2)) < 5e-2, jnp.max(jnp.abs(out3 - ref2))

    print("KERNEL_OK")
</pallas_src>

<mosaic_0001>
module attributes {stable_mosaic.version = 11 : i64} {
  func.func @diff_predictor_kernel(%arg0: i32, %arg1: memref<8x96xf32, #tpu.memory_space<vmem>>, %arg2: memref<8x96xf32, #tpu.memory_space<vmem>>, %arg3: memref<96x8xf32, #tpu.memory_space<vmem>>, %arg4: memref<1x8xf32, #tpu.memory_space<vmem>>, %arg5: memref<1x8xf32, #tpu.memory_space<vmem>>, %arg6: memref<1x8xf32, #tpu.memory_space<vmem>>, %arg7: memref<1x1xf32, #tpu.memory_space<vmem>>, %arg8: memref<8x1xf32, #tpu.memory_space<vmem>>, %arg9: memref<16x96xf32, #tpu.memory_space<vmem>>) attributes {dimension_semantics = [#tpu.dimension_semantics<parallel>], iteration_bounds = array<i64: 1>, scalar_prefetch = 0 : i64, scratch_operands = 1 : i64, tpu.core_type = #tpu.core_type<tc>, window_params = [{transform_indices = @transform_0, window_bounds = array<i64: 8, 96>}, {transform_indices = @transform_1, window_bounds = array<i64: 8, 96>}, {pipeline_mode = #tpu.pipeline_mode<synchronous>, transform_indices = @transform_2, window_bounds = array<i64: 96, 8>}, {pipeline_mode = #tpu.pipeline_mode<synchronous>, transform_indices = @transform_3, window_bounds = array<i64: 1, 8>}, {pipeline_mode = #tpu.pipeline_mode<synchronous>, transform_indices = @transform_4, window_bounds = array<i64: 1, 8>}, {pipeline_mode = #tpu.pipeline_mode<synchronous>, transform_indices = @transform_5, window_bounds = array<i64: 1, 8>}, {pipeline_mode = #tpu.pipeline_mode<synchronous>, transform_indices = @transform_6, window_bounds = array<i64: 1, 1>}, {transform_indices = @transform_7, window_bounds = array<i64: 8, 1>}]} {
    %c0 = arith.constant 0 : index
    %c0_0 = arith.constant 0 : index
    %0 = vector.load %arg1[%c0, %c0_0] : memref<8x96xf32, #tpu.memory_space<vmem>>, vector<8x96xf32>
    %c0_1 = arith.constant 0 : index
    %c0_2 = arith.constant 0 : index
    %1 = vector.load %arg9[%c0_1, %c0_2] : memref<16x96xf32, #tpu.memory_space<vmem>>, vector<8x96xf32>
    tpu.vector_store %arg9[%c0_1, %c0_2], %0 {strides = array<i32>} : memref<16x96xf32, #tpu.memory_space<vmem>>, vector<8x96xf32>,
    %c0_3 = arith.constant 0 : index
    %c0_4 = arith.constant 0 : index
    %2 = vector.load %arg2[%c0_3, %c0_4] : memref<8x96xf32, #tpu.memory_space<vmem>>, vector<8x96xf32>
    %c8 = arith.constant 8 : index
    %c0_5 = arith.constant 0 : index
    %3 = vector.load %arg9[%c8, %c0_5] : memref<16x96xf32, #tpu.memory_space<vmem>>, vector<8x96xf32>
    tpu.vector_store %arg9[%c8, %c0_5], %2 {strides = array<i32>} : memref<16x96xf32, #tpu.memory_space<vmem>>, vector<8x96xf32>,
    %c0_6 = arith.constant 0 : index
    %c0_7 = arith.constant 0 : index
    %4 = vector.load %arg9[%c0_6, %c0_7] : memref<16x96xf32, #tpu.memory_space<vmem>>, vector<16x96xf32>
    %c0_8 = arith.constant 0 : index
    %c0_9 = arith.constant 0 : index
    %5 = vector.load %arg3[%c0_8, %c0_9] : memref<96x8xf32, #tpu.memory_space<vmem>>, vector<96x8xf32>
    %cst = arith.constant dense<0.000000e+00> : vector<16x8xf32>
    %6 = tpu.matmul %4, %5, %cst {dimension_numbers = #tpu.dot_dimension_numbers<[1], [0], [0], [1], [0, 0, 1, 1], [], []>} : vector<16x96xf32>, vector<96x8xf32>, vector<16x8xf32> -> vector<16x8xf32>
    %c0_10 = arith.constant 0 : index
    %c0_11 = arith.constant 0 : index
    %7 = vector.load %arg4[%c0_10, %c0_11] : memref<1x8xf32, #tpu.memory_space<vmem>>, vector<1x8xf32>
    %8 = vector.broadcast %7 : vector<1x8xf32> to vector<16x8xf32>
    %9 = arith.addf %6, %8 : vector<16x8xf32>
    %10 = math.tanh %9 : vector<16x8xf32>
    %11 = vector.extract_strided_slice %10 {offsets = [0, 0], sizes = [8, 8], strides = [1, 1]} : vector<16x8xf32> to vector<8x8xf32>
    %12 = vector.extract_strided_slice %10 {offsets = [8, 0], sizes = [8, 8], strides = [1, 1]} : vector<16x8xf32> to vector<8x8xf32>
    %c0_12 = arith.constant 0 : index
    %c0_13 = arith.constant 0 : index
    %13 = vector.load %arg5[%c0_12, %c0_13] : memref<1x8xf32, #tpu.memory_space<vmem>>, vector<1x8xf32>
    %14 = vector.broadcast %13 : vector<1x8xf32> to vector<8x8xf32>
    %15 = arith.mulf %11, %14 : vector<8x8xf32>
    %c0_14 = arith.constant 0 : index
    %c0_15 = arith.constant 0 : index
    %16 = vector.load %arg6[%c0_14, %c0_15] : memref<1x8xf32, #tpu.memory_space<vmem>>, vector<1x8xf32>
    %17 = vector.broadcast %16 : vector<1x8xf32> to vector<8x8xf32>
    %18 = arith.mulf %12, %17 : vector<8x8xf32>
    %19 = arith.addf %15, %18 : vector<8x8xf32>
    %cst_16 = arith.constant dense<0.000000e+00> : vector<8xf32>
    %20 = vector.multi_reduction <add>, %19, %cst_16 [1] : vector<8x8xf32> to vector<8xf32>
    %21 = vector.shape_cast %20 : vector<8xf32> to vector<8x1xf32>
    %c0_17 = arith.constant 0 : index
    %c0_18 = arith.constant 0 : index
    %22 = vector.load %arg7[%c0_17, %c0_18] : memref<1x1xf32, #tpu.memory_space<vmem>>, vector<1x1xf32>
    %23 = vector.broadcast %22 : vector<1x1xf32> to vector<8x1xf32>
    %24 = arith.addf %21, %23 : vector<8x1xf32>
    %c0_19 = arith.constant 0 : index
    %c0_20 = arith.constant 0 : index
    %25 = vector.load %arg8[%c0_19, %c0_20] : memref<8x1xf32, #tpu.memory_space<vmem>>, vector<8x1xf32>
    tpu.vector_store %arg8[%c0_19, %c0_20], %24 {strides = array<i32>} : memref<8x1xf32, #tpu.memory_space<vmem>>, vector<8x1xf32>,
    return
  }
  func.func @transform_0(%arg0: i32) -> (i32, i32) {
    %c0_i32 = arith.constant 0 : i32
    %c0_i32_0 = arith.constant 0 : i32
    return %arg0, %c0_i32 : i32, i32
  }
  func.func @transform_1(%arg0: i32) -> (i32, i32) {
    %c0_i32 = arith.constant 0 : i32
    %c0_i32_0 = arith.constant 0 : i32
    return %arg0, %c0_i32 : i32, i32
  }
  func.func @transform_2(%arg0: i32) -> (i32, i32) {
    %c0_i32 = arith.constant 0 : i32
    %c0_i32_0 = arith.constant 0 : i32
    %c0_i32_1 = arith.constant 0 : i32
    return %c0_i32, %c0_i32_0 : i32, i32
  }
  func.func @transform_3(%arg0: i32) -> (i32, i32) {
    %c0_i32 = arith.constant 0 : i32
    %c0_i32_0 = arith.constant 0 : i32
    %c0_i32_1 = arith.constant 0 : i32
    return %c0_i32, %c0_i32_0 : i32, i32
  }
  func.func @transform_4(%arg0: i32) -> (i32, i32) {
    %c0_i32 = arith.constant 0 : i32
    %c0_i32_0 = arith.constant 0 : i32
    %c0_i32_1 = arith.constant 0 : i32
    return %c0_i32, %c0_i32_0 : i32, i32
  }
  func.func @transform_5(%arg0: i32) -> (i32, i32) {
    %c0_i32 = arith.constant 0 : i32
    %c0_i32_0 = arith.constant 0 : i32
    %c0_i32_1 = arith.constant 0 : i32
    return %c0_i32, %c0_i32_0 : i32, i32
  }
  func.func @transform_6(%arg0: i32) -> (i32, i32) {
    %c0_i32 = arith.constant 0 : i32
    %c0_i32_0 = arith.constant 0 : i32
    %c0_i32_1 = arith.constant 0 : i32
    return %c0_i32, %c0_i32_0 : i32, i32
  }
  func.func @transform_7(%arg0: i32) -> (i32, i32) {
    %c0_i32 = arith.constant 0 : i32
    %c0_i32_0 = arith.constant 0 : i32
    return %arg0, %c0_i32 : i32, i32
  }
}

</mosaic_0001>

<bundles_post_ra>
// kernel: tpu_custom_call.1
= control target key start
LH: loop header
LB: loop body
LE: loop exit
PB: predicated region body
PF: predicated region fallthrough
CT: control target
= control target key end

     0   :  { %vm29_vm0 = vcmask 785408   ;;  %vm154_vm1 = vcmask 64512   ;;  %vm166_vm2 = vcmask 7168   ;;  %s348_s2 = inlined_call_operand.vmem [shape: f32[96,8], index: 2, kind: input, shape index: {}]   ;;  %s349_s0 = inlined_call_operand.vmem [shape: f32[8,96], index: 0, kind: input, shape index: {}]   ;;  %s350_s1 = inlined_call_operand.vmem [shape: f32[8,96], index: 1, kind: input, shape index: {}]   ;;  %s351_s6 = inlined_call_operand.<no memory space> [shape: f32[1,1], index: 6, kind: input, shape index: {}]   ;;  %s352_s3 = inlined_call_operand.vmem [shape: f32[1,8], index: 3, kind: input, shape index: {}]   ;;  %s353_s5 = inlined_call_operand.vmem [shape: f32[1,8], index: 5, kind: input, shape index: {}]   ;;  %s354_s4 = inlined_call_operand.vmem [shape: f32[1,8], index: 4, kind: input, shape index: {}]   ;;  %s355_s7 = inlined_call_operand.vmem [shape: f32[8,1], index: 7, kind: output, shape index: {}]  }
   0x1   :  { %v35_v0 = vld [vmem:[%s348_s2] sm:$0xff]  ;;  %v36_v1 = vld [vmem:[%s348_s2 + $0x8] sm:$0xff]  ;;  %v37_v2 = vld [vmem:[%s348_s2 + $0x10] sm:$0xff]  ;;  %v12_v22 = vstv %s351_s6 }
   0x2   :  { %v219_v3 = vpack.c.bf16 %v36_v1, %v35_v0  ;;  %v38_v4 = vld [vmem:[%s348_s2 + $0x18] sm:$0xff]  ;;  %v39_v6 = vld [vmem:[%s348_s2 + $0x20] sm:$0xff]  ;;  %v40_v7 = vld [vmem:[%s348_s2 + $0x28] sm:$0xff]  ;;  %13 = vst [vmem:[#allocation3] sm:$0x1] %v12_v22 }
   0x3   :  { %v223_v5 = vpack.c.bf16 %v38_v4, %v37_v2  ;;  %v28_v8 = vld [vmem:[%s349_s0] sm:$0xff]  ;;  %v227_v10 = vpack.c.bf16 %v40_v7, %v39_v6  ;;  %v41_v11 = vld [vmem:[%s348_s2 + $0x30] sm:$0xff]  ;;  %v42_v12 = vld [vmem:[%s348_s2 + $0x38] sm:$0xff] }
   0x4   :  { %220 = vmatprep.subr.bf16.mxu0 %v219_v3  ;;  %v31_v9 = vld [vmem:[%s350_s1] sm:$0xff]  ;;  %30 = vst.msk [vmem:[#allocation2] sm:$0xff] %vm29_vm0, %v28_v8  ;;  %v231_v13 = vpack.c.bf16 %v42_v12, %v41_v11  ;;  %v44_v15 = vld [vmem:[%s348_s2 + $0x48] sm:$0xff]  ;;  %v45_v18 = vld [vmem:[%s348_s2 + $0x50] sm:$0xff] }
   0x5   :  { %222 = vmatpush3.bf16.msra.mxu0 %v219_v3  ;;  %32 = vst.msk [vmem:[#allocation2 + $0x8] sm:$0xff] %vm29_vm0, %v31_v9  ;;  %v43_v14 = vld [vmem:[%s348_s2 + $0x40] sm:$0xff]  ;;  %v46_v19 = vld [vmem:[%s348_s2 + $0x58] sm:$0xff] }
   0x6   :  { %224 = vmatprep.subr.bf16.mxu0 %v223_v5  ;;  %v235_v17 = vpack.c.bf16 %v44_v15, %v43_v14  ;;  %v239_v20 = vpack.c.bf16 %v46_v19, %v45_v18  ;;  %v172_v23 = vld [vmem:[%s352_s3] ss:$0 sm:$0xff] }
   0x7   :  { %v176_v28 = vld [vmem:[%s353_s5] ss:$0 sm:$0xff] }
   0x8   :  { %v175_v29 = vld [vmem:[%s354_s4] ss:$0 sm:$0xff] }
   0x9   :  { %226 = vmatpush3.bf16.msra.mxu0 %v223_v5  ;;  %v177_v36 = vld [vmem:[#allocation3] ss:$0 sm:$0xff] }
   0xa   :  { %228 = vmatprep.subr.bf16.mxu0 %v227_v10 }
   0xb   :  { %v33_v16 = vld [vmem:[#allocation2] sm:$0xff] }
   0xc   :  { %216 = vmatprep.mubr.msk.f32.mxu0 %vm29_vm0, %v33_v16  ;;  %v34_v21 = vld [vmem:[#allocation2 + $0x8] sm:$0xff] }
   0xd   :  { %230 = vmatpush3.bf16.msra.mxu0 %v227_v10 }
   0xe   :  { %232 = vmatprep.subr.bf16.mxu0 %v231_v13 }
  0x11   :  { %234 = vmatpush3.bf16.msra.mxu0 %v231_v13 }
  0x12   :  { %236 = vmatprep.subr.bf16.mxu0 %v235_v17 }
  0x15   :  { %238 = vmatpush3.bf16.msra.mxu0 %v235_v17 }
  0x16   :  { %240 = vmatprep.subr.bf16.mxu0 %v239_v20 }
  0x19   :  { %242 = vmatpush3.bf16.msra.mxu0 %v239_v20 }
  0x1c   :  { %217 = vmatmul.mubr.msk.f32.vlgmr.msra.gmra.mrb[0].mxu0 %vm29_vm0, %v34_v21 }
  0xef   :  { %v218_v24 = vpop.f32.mrb[0].mxu0 }
  0xf0   :  { %v132_v25 = vadd.f32 %v218_v24, %v172_v23  ;;  %v126_v26 = vpop.f32.mrb[1].mxu0 }
  0xf1   :  { %v127_v27 = vadd.f32 %v172_v23, %v126_v26 }
  0xf2   :  { %243 = vtanh.f32 %v132_v25 }
  0xf3   :  { %245 = vtanh.f32 %v127_v27 }
  0xfc   :  { %v244_v30 = vpop.eup %243 }
  0xfd   :  { %v246_v31 = vpop.eup %245  ;;  %v152_v32 = vmul.f32 %v244_v30, %v176_v28 }
  0xfe   :  { %v144_v33 = vmul.f32 %v246_v31, %v175_v29 }
 0x100   :  { %v153_v34 = vadd.f32 %v152_v32, %v144_v33 }
 0x102   :  { %v155_v35 = vsel %vm154_vm1, %v153_v34, 0.0 }
 0x103   :  { %156 = vadd.xlane.f32.xlu0 %v155_v35 }
 0x190   :  { %v157_v37 = vpop.xlane.xlu0 %156 }
 0x191   :  { %v165_v38 = vadd.f32 %v177_v36, %v157_v37 }
 0x193   :  { %167 = vst.msk [vmem:[%s355_s7] sm:$0xff] %vm166_vm2, %v165_v38 }

</bundles_post_ra>
